<compile_context>
chip_gen: v5e
topology: v5e:2x2
jax: 0.10.0
libtpu: 0.0.40
codegen_flags: <defaults>
</compile_context>

<pallas_src>
import functools

import jax
import jax.numpy as jnp
from jax.experimental import pallas as pl
from jax.experimental.pallas import tpu as pltpu


def _keypoint_mse_kernel(*refs, sigma, scale, reduction, has_weight):
    """Elementwise MSE -> GMOF -> optional weighting -> reduction.

    All operands are (B, K*D): K*D on the 128-lane axis, B on sublanes.
    """
    if has_weight:
        pred_ref, target_ref, w_ref, out_ref = refs
    else:
        pred_ref, target_ref, out_ref = refs

    pred = pred_ref[...].astype(jnp.float32)
    target = target_ref[...].astype(jnp.float32)

    # F.mse_loss(pred, target, reduction='none')
    diff = pred - target
    l = diff * diff

    # gmof(loss, sigma) = sigma^2 * loss^2 / (sigma^2 + loss^2)
    s2 = jnp.float32(sigma * sigma)
    l2 = l * l
    g = (s2 * l2) * pl.reciprocal(s2 + l2, approx=False)

    if has_weight:
        # Weight already expanded to (B, K*D) (and pre-scaled by loss_weight
        # when reduction == 'none'): a single lane-aligned vmul.
        g = g * w_ref[...]

    if reduction == 'none':
        if scale != 1.0:  # only when no weight operand absorbed loss_weight
            g = g * jnp.float32(scale)
        out_ref[...] = g.astype(out_ref.dtype)
    else:
        total = jnp.sum(g)
        if scale != 1.0:  # loss_weight / avg_factor folded into one scalar mul
            total = total * jnp.float32(scale)
        out_ref[0, 0] = total


def keypoint_mse_loss(pred, target, pred_conf=None, target_conf=None,
                      keypoint_weight=None, *, sigma=1.0, loss_weight=1.0,
                      reduction='mean', avg_factor=None):
    """JAX wrapper mirroring KeypointMSELoss.forward."""
    assert reduction in ('none', 'mean', 'sum')
    if avg_factor is not None and reduction == 'sum':
        raise ValueError('avg_factor can not be used with reduction="sum"')
    B, K, D = pred.shape

    # Free (contiguous) reshape to a lane-dense 2D slab.
    pred_f = pred.reshape(B, K * D)
    target_f = target.reshape(B, K * D)

    # Fuse the optional weights into a single (B, K*D) operand; skip entirely
    # when none are provided (defaults are all 1.0 -> no-op).
    w = None
    if keypoint_weight is not None:
        w = jnp.asarray(keypoint_weight, jnp.float32).reshape(1, K, 1)
    if pred_conf is not None:
        pc = jnp.asarray(pred_conf, jnp.float32).reshape(B, K, 1)
        w = pc if w is None else w * pc
    if target_conf is not None:
        tc = jnp.asarray(target_conf, jnp.float32).reshape(B, K, 1)
        w = tc if w is None else w * tc
    has_weight = w is not None

    # Fold loss_weight / avg_factor into a single scalar.
    if reduction == 'none':
        if has_weight:
            w = w * jnp.float32(loss_weight)
            scale = 1.0
        else:
            scale = float(loss_weight)
    elif reduction == 'mean':
        div = float(avg_factor) if avg_factor is not None else float(B * K * D)
        if div <= 0.0:
            raise ValueError(
                "reduction='mean' requires a positive avg_factor / element "
                f"count, got {div}")
        scale = float(loss_weight) / div
    else:  # 'sum'
        scale = float(loss_weight)

    if has_weight:
        w = jnp.broadcast_to(w, (B, K, D)).reshape(B, K * D)

    if reduction == 'none':
        out_shape = jax.ShapeDtypeStruct((B, K * D), jnp.float32)
        out_spec = pl.BlockSpec(memory_space=pltpu.MemorySpace.VMEM)
    else:
        out_shape = jax.ShapeDtypeStruct((1, 1), jnp.float32)
        out_spec = pl.BlockSpec(memory_space=pltpu.MemorySpace.SMEM)

    kernel = functools.partial(
        _keypoint_mse_kernel,
        sigma=float(sigma),
        scale=scale,
        reduction=reduction,
        has_weight=has_weight,
    )

    operands = [pred_f, target_f] + ([w] if has_weight else [])

    out = pl.pallas_call(
        kernel,
        out_shape=out_shape,
        in_specs=[pl.BlockSpec(memory_space=pltpu.MemorySpace.VMEM)]
        * len(operands),
        out_specs=out_spec,
    )(*operands)

    if reduction == 'none':
        return out.reshape(B, K, D)  # free reshape back to module layout
    return out[0, 0]


def _reference(pred, target, pred_conf, target_conf, kw, sigma, loss_weight,
               reduction, avg_factor=None):
    pred = pred.astype(jnp.float32)
    target = target.astype(jnp.float32)
    l = (pred - target) ** 2
    s2 = sigma ** 2
    g = s2 * l ** 2 / (s2 + l ** 2)
    w = jnp.ones((1, 1, 1), jnp.float32)
    if kw is not None:
        w = w * kw.reshape(1, -1, 1)
    if pred_conf is not None:
        w = w * pred_conf[:, :, None]
    if target_conf is not None:
        w = w * target_conf[:, :, None]
    loss = g * w
    if avg_factor is not None and reduction == 'mean':
        loss = jnp.sum(loss) / avg_factor
    elif reduction == 'mean':
        loss = jnp.mean(loss)
    elif reduction == 'sum':
        loss = jnp.sum(loss)
    return loss_weight * loss


if __name__ == "__main__":
    B, K, D = 2, 17, 3
    sigma = 2.0
    loss_weight = 0.5

    key = jax.random.PRNGKey(0)
    k1, k2, k3, k4 = jax.random.split(key, 4)
    pred = jax.random.normal(k1, (B, K, D), dtype=jnp.float32)
    target = jax.random.normal(k2, (B, K, D), dtype=jnp.float32)
    pred_conf = jax.random.uniform(k3, (B, K), dtype=jnp.float32)
    target_conf = jax.random.uniform(k4, (B, K), dtype=jnp.float32)
    # Deterministic keypoint_weight "parameter" (shape (K,), as in __init__).
    keypoint_weight = 0.5 + 0.05 * jnp.arange(K, dtype=jnp.float32)

    # reduction='mean' (module default), all optional weights present.
    loss_mean = keypoint_mse_loss(pred, target, pred_conf, target_conf,
                                  keypoint_weight, sigma=sigma,
                                  loss_weight=loss_weight, reduction='mean')
    jax.block_until_ready(loss_mean)
    ref_mean = _reference(pred, target, pred_conf, target_conf,
                          keypoint_weight, sigma, loss_weight, 'mean')
    assert jnp.allclose(loss_mean, ref_mean, rtol=1e-5, atol=1e-6)

    # reduction='mean' with explicit avg_factor.
    loss_avg = keypoint_mse_loss(pred, target, pred_conf, target_conf,
                                 keypoint_weight, sigma=sigma,
                                 loss_weight=loss_weight, reduction='mean',
                                 avg_factor=10.0)
    jax.block_until_ready(loss_avg)
    ref_avg = _reference(pred, target, pred_conf, target_conf,
                         keypoint_weight, sigma, loss_weight, 'mean',
                         avg_factor=10.0)
    assert jnp.allclose(loss_avg, ref_avg, rtol=1e-5, atol=1e-6)

    # reduction='none' (elementwise output, module layout (B, K, D)).
    loss_none = keypoint_mse_loss(pred, target, pred_conf, target_conf,
                                  keypoint_weight, sigma=sigma,
                                  loss_weight=loss_weight, reduction='none')
    jax.block_until_ready(loss_none)
    ref_none = _reference(pred, target, pred_conf, target_conf,
                          keypoint_weight, sigma, loss_weight, 'none')
    assert loss_none.shape == (B, K, D)
    assert jnp.allclose(loss_none, ref_none, rtol=1e-5, atol=1e-6)

    # reduction='sum', no optional weights -> specialized (weight-free) kernel.
    loss_sum = keypoint_mse_loss(pred, target, sigma=sigma,
                                 loss_weight=loss_weight, reduction='sum')
    jax.block_until_ready(loss_sum)
    ref_sum = _reference(pred, target, None, None, None, sigma, loss_weight,
                         'sum')
    assert jnp.allclose(loss_sum, ref_sum, rtol=1e-5, atol=1e-6)

    # bf16 inputs: DMA'd in native dtype, upcast inside the kernel.
    pred_bf = pred.astype(jnp.bfloat16)
    target_bf = target.astype(jnp.bfloat16)
    loss_bf = keypoint_mse_loss(pred_bf, target_bf, pred_conf, target_conf,
                                keypoint_weight, sigma=sigma,
                                loss_weight=loss_weight, reduction='mean')
    jax.block_until_ready(loss_bf)
    ref_bf = _reference(pred_bf, target_bf, pred_conf, target_conf,
                        keypoint_weight, sigma, loss_weight, 'mean')
    assert jnp.allclose(loss_bf, ref_bf, rtol=1e-5, atol=1e-6)

    print("KERNEL_OK")
</pallas_src>

<mosaic_0001>
module attributes {stable_mosaic.version = 11 : i64} {
  func.func @_keypoint_mse_kernel(%arg0: memref<2x51xf32, #tpu.memory_space<vmem>>, %arg1: memref<2x51xf32, #tpu.memory_space<vmem>>, %arg2: memref<2x51xf32, #tpu.memory_space<vmem>>, %arg3: memref<1x1xf32, #tpu.memory_space<smem>>) attributes {dimension_semantics = [], scalar_prefetch = 0 : i64, scratch_operands = 0 : i64, tpu.core_type = #tpu.core_type<tc>} {
    %c0 = arith.constant 0 : index
    %c0_0 = arith.constant 0 : index
    %0 = vector.load %arg0[%c0, %c0_0] : memref<2x51xf32, #tpu.memory_space<vmem>>, vector<2x51xf32>
    %c0_1 = arith.constant 0 : index
    %c0_2 = arith.constant 0 : index
    %1 = vector.load %arg1[%c0_1, %c0_2] : memref<2x51xf32, #tpu.memory_space<vmem>>, vector<2x51xf32>
    %2 = arith.subf %0, %1 : vector<2x51xf32>
    %3 = arith.mulf %2, %2 : vector<2x51xf32>
    %4 = arith.mulf %3, %3 : vector<2x51xf32>
    %cst = arith.constant 4.000000e+00 : f32
    %5 = vector.broadcast %cst : f32 to vector<2x51xf32>
    %6 = arith.mulf %5, %4 : vector<2x51xf32>
    %cst_3 = arith.constant 4.000000e+00 : f32
    %7 = vector.broadcast %cst_3 : f32 to vector<2x51xf32>
    %8 = arith.addf %7, %4 : vector<2x51xf32>
    %9 = tpu.reciprocal %8 : vector<2x51xf32> -> vector<2x51xf32>
    %10 = arith.mulf %6, %9 : vector<2x51xf32>
    %c0_4 = arith.constant 0 : index
    %c0_5 = arith.constant 0 : index
    %11 = vector.load %arg2[%c0_4, %c0_5] : memref<2x51xf32, #tpu.memory_space<vmem>>, vector<2x51xf32>
    %12 = arith.mulf %10, %11 : vector<2x51xf32>
    %13 = vector.shape_cast %12 : vector<2x51xf32> to vector<1x2x51xf32>
    %cst_6 = arith.constant dense<0.000000e+00> : vector<1xf32>
    %14 = vector.multi_reduction <add>, %13, %cst_6 [1, 2] : vector<1x2x51xf32> to vector<1xf32>
    %15 = vector.shape_cast %14 : vector<1xf32> to vector<1x1x1xf32>
    %16 = vector.extract %15[0, 0, 0] : f32 from vector<1x1x1xf32>
    %cst_7 = arith.constant 0.00490196096 : f32
    %17 = arith.mulf %16, %cst_7 : f32
    %c0_8 = arith.constant 0 : index
    %c0_9 = arith.constant 0 : index
    %18 = memref.load %arg3[%c0_8, %c0_9] : memref<1x1xf32, #tpu.memory_space<smem>>
    memref.store %17, %arg3[%c0_8, %c0_9] : memref<1x1xf32, #tpu.memory_space<smem>>
    return
  }
}

</mosaic_0001>

<bundles_post_ra>
// kernel: tpu_custom_call.1
= control target key start
LH: loop header
LB: loop body
LE: loop exit
PB: predicated region body
PF: predicated region fallthrough
CT: control target
= control target key end

     0   :  { %8 = vsyncpa [#allocation3], 0  ;;  %s245_s0 = inlined_call_operand.hbm [shape: f32[2,51], index: 0, kind: input, shape index: {}]   ;;  %s246_s1 = inlined_call_operand.hbm [shape: f32[2,51], index: 1, kind: input, shape index: {}]   ;;  %s247_s2 = inlined_call_operand.hbm [shape: f32[2,51], index: 2, kind: input, shape index: {}]   ;;  %s248_s3 = inlined_call_operand.hbm [shape: f32[1,1], index: 3, kind: output, shape index: {}]  }
   0x1   :  { %9 = vsyncpa [#allocation6], 0  ;;  %s27_s14 = sshll.u32 %s246_s1, 4  ;;  %s28_s14 = int_to_ptr.hbm [resolvable:$true] %s27_s14 }
   0x2   :  { %10 = vsyncpa [#allocation4], 0  ;;  %s209_s15 = smov [#allocation5]   ;;  %s16_s19 = sshll.u32 %s245_s0, 4  ;;  %s17_s19 = int_to_ptr.hbm [resolvable:$true] %s16_s19 }
   0x3   :  { %s29_s16 = sshll.u32 %s209_s15, 4  ;;  %s210_s20 = smov [#allocation2]   ;;  %s30_s16 = int_to_ptr.vmem [resolvable:$true] %s29_s16 }
   0x4   :  { %32 = dma.hbm_to_vmem [thread:$0]  %s28_s14, 32, %s30_s16, [#allocation6]  }
   0x5   :  { %s18_s21 = sshll.u32 %s210_s20, 4  ;;  %s38_s24 = sshll.u32 %s247_s2, 4  ;;  %s19_s21 = int_to_ptr.vmem [resolvable:$true] %s18_s21  ;;  %s39_s24 = int_to_ptr.hbm [resolvable:$true] %s38_s24 }
   0x6   :  { %21 = dma.hbm_to_vmem [thread:$0]  %s17_s19, 32, %s19_s21, [#allocation3]  }
   0x7   :  { %s211_s1 = smov [#allocation7]  }
   0x8   :  { %s40_s25 = sshll.u32 %s211_s1, 4  ;;  %s41_s25 = int_to_ptr.vmem [resolvable:$true] %s40_s25 }
   0x9   :  { %43 = dma.hbm_to_vmem [thread:$0]  %s39_s24, 32, %s41_s25, [#allocation6]  }
   0xa   :  { %203 = dma.done.wait [#allocation3], 32  }
   0xb   :  { %204 = vsyncadd [#allocation3], 4294967264 }
   0xc   :  { %205 = dma.done.wait [#allocation6], 64  }
   0xd   :  { %206 = vsyncadd [#allocation6], 4294967232  ;;  %v56_v0 = vld [vmem:[#allocation2] sm:$0x3]  ;;  %v57_v1 = vld [vmem:[#allocation5] sm:$0x3] }
   0xe   :  { %v58_v2 = vsub.f32 %v56_v0, %v57_v1  ;;  %v78_v17 = vld [vmem:[#allocation7] sm:$0x3]  ;;  %vm80_vm4 = vcmask 410624   ;;  %s99_s26 = sshll.u32 %s248_s3, 4  ;;  %s212_s29 = smov [#allocation8]   ;;  %s100_s26 = int_to_ptr.hbm [resolvable:$true] %s99_s26 }
  0x10   :  { %v59_v3 = vmul.f32 %v58_v2, %v58_v2 }
  0x12   :  { %v60_v4 = vmul.f32 %v59_v3, %v59_v3 }
  0x14   :  { %v62_v5 = vadd.f32 4.0, %v60_v4  ;;  %v61_v13 = vmul.f32 4.0, %v60_v4 }
  0x16   :  { %117 = vrcp.f32 %v62_v5  ;;  %v74_v8 = vand.u32 2147483648, %v62_v5  ;;  %vm68_vm0 = vweird.f32 %v62_v5  ;;  %v72_v10 = vand.u32 2147483647, %v62_v5 }
  0x18   :  { %v75_v12 = vor.u32 1.1754944e-38, %v74_v8  ;;  %vm73_vm3 = vcmp.eq.f32.partialorder %v72_v10, 8.507059e+37 }
  0x1c   :  { %v118_v6 = vpop.eup %117 }
  0x1d   :  { %v64_v7 = vmul.f32 %v118_v6, %v62_v5  ;;  %vm69_vm1 = vweird.f32 %v118_v6 }
  0x1e   :  { %vm70_vm2 = vmor %vm68_vm0, %vm69_vm1 }
  0x1f   :  { %v65_v9 = vsub.f32 1.0, %v64_v7 }
  0x21   :  { %v66_v11 = vmul.f32 %v118_v6, %v65_v9 }
  0x23   :  { %v67_v14 = vadd.f32 %v118_v6, %v66_v11 }
  0x25   :  { %v71_v15 = vsel %vm70_vm2, %v118_v6, %v67_v14 }
  0x26   :  { %v76_v16 = vsel %vm73_vm3, %v75_v12, %v71_v15 }
  0x27   :  { %v77_v18 = vmul.f32 %v76_v16, %v61_v13 }
  0x29   :  { %v79_v19 = vmul.f32 %v78_v17, %v77_v18 }
  0x2b   :  { %v81_v20 = vsel %vm80_vm4, %v79_v19, 0.0 }
  0x2c   :  { %82 = vadd.xlane.f32.xlu0 %v81_v20 }
  0x9f   :  { %v83_v21 = vpop.xlane.xlu0 %82 }
  0xa0   :  { %v84_v22 = vrot.slane %v83_v21, 4 }
  0xa2   :  { %v85_v23 = vadd.f32 %v84_v22, %v83_v21 }
  0xa4   :  { %v86_v24 = vrot.slane %v85_v23, 2 }
  0xa6   :  { %v87_v25 = vadd.f32 %v86_v24, %v85_v23 }
  0xa8   :  { %v88_v26 = vrot.slane %v87_v25, 1 }
  0xaa   :  { %v89_v27 = vadd.f32 %v88_v26, %v87_v25 }
  0xac   :  { %111 = vpush %v89_v27 }
  0xdd   :  { %s112_s27 = spop %111 }
  0xde   :  { %s91_s28 = smul.f32 0.004901961, %s112_s27 }
  0xe0   :  { %93 = sst [smem:[#allocation8]] %s91_s28 }
  0xe1   :  { %102 = dma.smem_to_hbm %s212_s29, 16, %s100_s26, [#allocation4]  }
  0xe2   :  { %207 = dma.done.wait [#allocation4], 16  }
  0xe3   :  { %208 = vsyncadd [#allocation4], 4294967280 }
  0xe4   :  { %107 = sfence }
  0xe5   :  { %108 = vsyncpa [#allocation3], 1 }
  0xe6   :  { %109 = vsyncpa [#allocation6], 1 }
  0xe7   :  { %110 = vsyncpa [#allocation4], 1 }

</bundles_post_ra>
